<compile_context>
chip_gen: v7x
topology: tpu7x:2x2x1
jax: 0.10.0
libtpu: 0.0.40
codegen_flags: <defaults>
</compile_context>

<pallas_src>
import functools

import numpy as np

import jax
import jax.numpy as jnp
from jax import lax
from jax.experimental import pallas as pl
from jax.experimental.pallas import tpu as pltpu


# 3x3 tap offsets, row-major over (ky, kx) == (dy+1, dx+1).
_OFFSETS = tuple((dy, dx) for dy in (-1, 0, 1) for dx in (-1, 0, 1))


def _pick_images_per_step(batch, max_per_step=8):
    """Largest divisor of `batch` <= max_per_step keeping >= 2 grid steps."""
    best = 1
    for nb in range(1, min(max_per_step, batch) + 1):
        if batch % nb == 0 and batch // nb >= 2:
            best = nb
    return best


# ---------------------------------------------------------------------------
# Pallas kernel: nB images per grid step, lane-concatenated.
# ---------------------------------------------------------------------------
def _quality_t_kernel(rgb_ref, dep_ref, mask_ref, wflat_ref, bias_ref,
                      seg_ref, w1_ref, b1_ref, w2_ref, b2_ref, out_ref,
                      *, C, H, W, nB):
    HW = H * W
    L = nB * HW

    # Assemble the (2C, L) f32 tile: rgb/depth stacked on sublanes, the nB
    # images of this step concatenated along the lane axis (VMEM-only copies).
    if nB == 1:
        x_rgb, x_dep = rgb_ref[0], dep_ref[0]
    else:
        x_rgb = jnp.concatenate([rgb_ref[i] for i in range(nB)], axis=1)
        x_dep = jnp.concatenate([dep_ref[i] for i in range(nB)], axis=1)
    x = jnp.concatenate([x_rgb, x_dep], axis=0)               # (2C, L) f32

    masks = mask_ref[...]                                     # (9, L) f32 0/1

    # Both 3x3 / pad=1 convs as ONE MXU matmul: stack the 9 shifted+masked
    # taps along sublanes (roll/mask in f32, single bf16 cast at the MXU
    # boundary) and contract against the block-diagonal (2C, 9*2C) weight.
    # The edge masks also zero the cross-image wrap from the full-width roll.
    taps = []
    for k, (dy, dx) in enumerate(_OFFSETS):
        off = dy * W + dx
        if off == 0:
            taps.append(x)
        else:
            xs = pltpu.roll(x, shift=(-off) % L, axis=1)      # lane rotation
            taps.append(xs * masks[k:k + 1, :])
    stacked = jnp.concatenate(taps, axis=0).astype(jnp.bfloat16)  # (9*2C, L)

    feat = jnp.dot(wflat_ref[...], stacked,
                   preferred_element_type=jnp.float32) + bias_ref[...]  # (2C,L)

    combined = feat[:C, :] * feat[C:, :]                      # (C, L)

    # Channel softmax (sublane reduce), f32 throughout; exact reciprocal (EUP).
    m = jnp.max(combined, axis=0, keepdims=True)
    e = jnp.exp(combined - m)
    s = jnp.sum(e, axis=0, keepdims=True)
    prob = e * pl.reciprocal(s)                               # (C, L)

    # Per-image spatial mean-pool as a matmul against the constant segment
    # matrix (includes the 1/HW factor), then the fused 2-layer MLP epilogue.
    pooled = jnp.dot(prob, seg_ref[...],
                     preferred_element_type=jnp.float32)      # (C, nB)
    h = jnp.dot(w1_ref[...], pooled,
                preferred_element_type=jnp.float32) + b1_ref[...]
    h = jnp.maximum(h, 0.0)                                   # (C//2, nB)
    q = jnp.dot(w2_ref[...], h,
                preferred_element_type=jnp.float32) + b2_ref[...]   # (1, nB)
    out_ref[0] = q


# ---------------------------------------------------------------------------
# Wrapper: free input views + constant prep + pallas_call.
# ---------------------------------------------------------------------------
def quality_t_forward(rgb, depth, params, *, max_images_per_step=8):
    """rgb, depth: (B, C, H, W) float32 (NCHW, as in PyTorch). Returns (B, 1)."""
    B, C, H, W = rgb.shape
    HW = H * W
    C2 = 2 * C

    nB = _pick_images_per_step(B, max_images_per_step)
    ngroups = B // nB
    L = nB * HW

    # Free NCHW -> (B, C, HW) views; bf16 cast happens inside the kernel.
    rgb2 = rgb.reshape(B, C, HW).astype(jnp.float32)
    dep2 = depth.reshape(B, C, HW).astype(jnp.float32)

    # Fused block-diagonal tap weights reshaped for a single K=9*2C matmul:
    # wflat[:, k*2C:(k+1)*2C] == [[wr_k, 0], [0, wd_k]].
    wr = params["conv_rgb_w"].astype(jnp.float32)             # (C, C, 3, 3)
    wd = params["conv_depth_w"].astype(jnp.float32)
    wr_t = jnp.transpose(wr, (2, 3, 0, 1)).reshape(9, C, C)
    wd_t = jnp.transpose(wd, (2, 3, 0, 1)).reshape(9, C, C)
    z = jnp.zeros((9, C, C), jnp.float32)
    blocks = jnp.concatenate(
        [jnp.concatenate([wr_t, z], axis=2),
         jnp.concatenate([z, wd_t], axis=2)], axis=1)         # (9, 2C, 2C)
    wflat = jnp.transpose(blocks, (1, 0, 2)).reshape(C2, 9 * C2)
    wflat = wflat.astype(jnp.bfloat16)

    bias = jnp.concatenate(
        [params["conv_rgb_b"], params["conv_depth_b"]]).reshape(C2, 1)
    bias = bias.astype(jnp.float32)

    # Per-tap boundary masks (padding=1 => out-of-image taps contribute 0),
    # built in numpy (static H, W) and tiled nB times along the lane axis.
    yy = np.arange(H).reshape(H, 1)
    xx = np.arange(W).reshape(1, W)
    mask_np = np.stack(
        [((yy + dy >= 0) & (yy + dy < H) & (xx + dx >= 0) & (xx + dx < W))
         .reshape(HW) for dy, dx in _OFFSETS]).astype(np.float32)   # (9, HW)
    mask = jnp.asarray(np.tile(mask_np, (1, nB)))                    # (9, L)

    # Per-image mean-pool matrix: seg[p, i] = 1/HW iff pixel p is in image i.
    seg_np = np.zeros((L, nB), np.float32)
    for i in range(nB):
        seg_np[i * HW:(i + 1) * HW, i] = 1.0 / HW
    seg = jnp.asarray(seg_np)

    w1 = params["mlp_w1"].astype(jnp.float32)                 # (C//2, C)
    b1 = params["mlp_b1"].reshape(C // 2, 1).astype(jnp.float32)
    w2 = params["mlp_w2"].astype(jnp.float32)                 # (1, C//2)
    b2 = params["mlp_b2"].reshape(1, 1).astype(jnp.float32)

    kernel = functools.partial(_quality_t_kernel, C=C, H=H, W=W, nB=nB)
    q = pl.pallas_call(
        kernel,
        out_shape=jax.ShapeDtypeStruct((ngroups, 1, nB), jnp.float32),
        grid=(ngroups,),
        in_specs=[
            pl.BlockSpec((nB, C, HW), lambda g: (g, 0, 0)),   # rgb images
            pl.BlockSpec((nB, C, HW), lambda g: (g, 0, 0)),   # depth images
            pl.BlockSpec((9, L), lambda g: (0, 0)),           # tap masks
            pl.BlockSpec((C2, 9 * C2), lambda g: (0, 0)),     # fused conv w
            pl.BlockSpec((C2, 1), lambda g: (0, 0)),          # fused conv bias
            pl.BlockSpec((L, nB), lambda g: (0, 0)),          # mean-pool matrix
            pl.BlockSpec((C // 2, C), lambda g: (0, 0)),      # mlp w1
            pl.BlockSpec((C // 2, 1), lambda g: (0, 0)),      # mlp b1
            pl.BlockSpec((1, C // 2), lambda g: (0, 0)),      # mlp w2
            pl.BlockSpec((1, 1), lambda g: (0, 0)),           # mlp b2
        ],
        out_specs=pl.BlockSpec((1, 1, nB), lambda g: (g, 0, 0)),
        compiler_params=pltpu.CompilerParams(
            dimension_semantics=("parallel",)),
    )(rgb2, dep2, mask, wflat, bias, seg, w1, b1, w2, b2)

    return q.reshape(B, 1)                                    # image-major order


# ---------------------------------------------------------------------------
# Pure-JAX f32 reference (mirrors the PyTorch forward) for correctness check.
# ---------------------------------------------------------------------------
def quality_t_reference(rgb, depth, params):
    dn = ("NCHW", "OIHW", "NCHW")
    rgb_feat = lax.conv_general_dilated(
        rgb, params["conv_rgb_w"], (1, 1), "SAME", dimension_numbers=dn
    ) + params["conv_rgb_b"][None, :, None, None]
    depth_feat = lax.conv_general_dilated(
        depth, params["conv_depth_w"], (1, 1), "SAME", dimension_numbers=dn
    ) + params["conv_depth_b"][None, :, None, None]
    combined = rgb_feat * depth_feat
    combined = jax.nn.softmax(combined, axis=1)
    pooled = combined.mean(axis=(2, 3))                       # (B, C)
    h = jax.nn.relu(pooled @ params["mlp_w1"].T + params["mlp_b1"])
    return h @ params["mlp_w2"].T + params["mlp_b2"]          # (B, 1)


# ---------------------------------------------------------------------------
# Deterministic parameter init (shapes from QualityTCalculation.__init__).
# ---------------------------------------------------------------------------
def init_params(key, channel):
    ks = jax.random.split(key, 8)
    scale = 0.1
    return {
        "conv_rgb_w":   scale * jax.random.normal(ks[0], (channel, channel, 3, 3), jnp.float32),
        "conv_rgb_b":   scale * jax.random.normal(ks[1], (channel,), jnp.float32),
        "conv_depth_w": scale * jax.random.normal(ks[2], (channel, channel, 3, 3), jnp.float32),
        "conv_depth_b": scale * jax.random.normal(ks[3], (channel,), jnp.float32),
        "mlp_w1":       scale * jax.random.normal(ks[4], (channel // 2, channel), jnp.float32),
        "mlp_b1":       scale * jax.random.normal(ks[5], (channel // 2,), jnp.float32),
        "mlp_w2":       scale * jax.random.normal(ks[6], (1, channel // 2), jnp.float32),
        "mlp_b2":       scale * jax.random.normal(ks[7], (1,), jnp.float32),
    }


if __name__ == "__main__":
    B, C, H, W = 2, 4, 16, 16
    key = jax.random.PRNGKey(0)
    k_rgb, k_depth, k_params = jax.random.split(key, 3)

    rgb = jax.random.normal(k_rgb, (B, C, H, W), jnp.float32)
    depth = jax.random.normal(k_depth, (B, C, H, W), jnp.float32)
    params = init_params(k_params, C)

    fwd = jax.jit(quality_t_forward)
    out = jax.block_until_ready(fwd(rgb, depth, params))

    ref = jax.block_until_ready(quality_t_reference(rgb, depth, params))
    assert out.shape == (B, 1), out.shape
    # bf16 conv weights/activations (f32 accumulation) vs the f32 reference
    # => compare with a bf16-level tolerance.
    if not jnp.allclose(out, ref, atol=5e-3, rtol=5e-3):
        raise AssertionError(
            f"mismatch: pallas={out} ref={ref} "
            f"max_abs_diff={jnp.max(jnp.abs(out - ref))}")

    print("KERNEL_OK")
</pallas_src>

<mosaic_0001>
module attributes {stable_mosaic.version = 11 : i64} {
  func.func @_quality_t_kernel(%arg0: i32, %arg1: memref<1x4x256xf32, #tpu.memory_space<vmem>>, %arg2: memref<1x4x256xf32, #tpu.memory_space<vmem>>, %arg3: memref<9x256xf32, #tpu.memory_space<vmem>>, %arg4: memref<8x72xbf16, #tpu.memory_space<vmem>>, %arg5: memref<8x1xf32, #tpu.memory_space<vmem>>, %arg6: memref<256x1xf32, #tpu.memory_space<vmem>>, %arg7: memref<2x4xf32, #tpu.memory_space<vmem>>, %arg8: memref<2x1xf32, #tpu.memory_space<vmem>>, %arg9: memref<1x2xf32, #tpu.memory_space<vmem>>, %arg10: memref<1x1xf32, #tpu.memory_space<vmem>>, %arg11: memref<1x1x1xf32, #tpu.memory_space<vmem>>) attributes {dimension_semantics = [#tpu.dimension_semantics<parallel>], iteration_bounds = array<i64: 2>, scalar_prefetch = 0 : i64, scratch_operands = 0 : i64, tpu.core_type = #tpu.core_type<tc>, window_params = [{transform_indices = @transform_0, window_bounds = array<i64: 1, 4, 256>}, {transform_indices = @transform_1, window_bounds = array<i64: 1, 4, 256>}, {pipeline_mode = #tpu.pipeline_mode<synchronous>, transform_indices = @transform_2, window_bounds = array<i64: 9, 256>}, {pipeline_mode = #tpu.pipeline_mode<synchronous>, transform_indices = @transform_3, window_bounds = array<i64: 8, 72>}, {pipeline_mode = #tpu.pipeline_mode<synchronous>, transform_indices = @transform_4, window_bounds = array<i64: 8, 1>}, {pipeline_mode = #tpu.pipeline_mode<synchronous>, transform_indices = @transform_5, window_bounds = array<i64: 256, 1>}, {pipeline_mode = #tpu.pipeline_mode<synchronous>, transform_indices = @transform_6, window_bounds = array<i64: 2, 4>}, {pipeline_mode = #tpu.pipeline_mode<synchronous>, transform_indices = @transform_7, window_bounds = array<i64: 2, 1>}, {pipeline_mode = #tpu.pipeline_mode<synchronous>, transform_indices = @transform_8, window_bounds = array<i64: 1, 2>}, {pipeline_mode = #tpu.pipeline_mode<synchronous>, transform_indices = @transform_9, window_bounds = array<i64: 1, 1>}, {transform_indices = @transform_10, window_bounds = array<i64: 1, 1, 1>}]} {
    %c0 = arith.constant 0 : index
    %c0_0 = arith.constant 0 : index
    %c0_1 = arith.constant 0 : index
    %0 = vector.load %arg1[%c0, %c0_0, %c0_1] : memref<1x4x256xf32, #tpu.memory_space<vmem>>, vector<1x4x256xf32>
    %1 = vector.shape_cast %0 : vector<1x4x256xf32> to vector<4x256xf32>
    %c0_2 = arith.constant 0 : index
    %c0_3 = arith.constant 0 : index
    %c0_4 = arith.constant 0 : index
    %2 = vector.load %arg2[%c0_2, %c0_3, %c0_4] : memref<1x4x256xf32, #tpu.memory_space<vmem>>, vector<1x4x256xf32>
    %3 = vector.shape_cast %2 : vector<1x4x256xf32> to vector<4x256xf32>
    %4 = tpu.concatenate %1, %3 in 0 : vector<4x256xf32>, vector<4x256xf32> -> vector<8x256xf32>
    %c0_5 = arith.constant 0 : index
    %c0_6 = arith.constant 0 : index
    %5 = vector.load %arg3[%c0_5, %c0_6] : memref<9x256xf32, #tpu.memory_space<vmem>>, vector<9x256xf32>
    %c17_i32 = arith.constant 17 : i32
    %6 = tpu.dynamic_rotate %4 by %c17_i32 dim 1 : vector<8x256xf32>, i32 -> vector<8x256xf32>
    %7 = vector.extract_strided_slice %5 {offsets = [0, 0], sizes = [1, 256], strides = [1, 1]} : vector<9x256xf32> to vector<1x256xf32>
    %8 = vector.broadcast %7 : vector<1x256xf32> to vector<8x256xf32>
    %9 = arith.mulf %6, %8 : vector<8x256xf32>
    %c16_i32 = arith.constant 16 : i32
    %10 = tpu.dynamic_rotate %4 by %c16_i32 dim 1 : vector<8x256xf32>, i32 -> vector<8x256xf32>
    %11 = vector.extract_strided_slice %5 {offsets = [1, 0], sizes = [1, 256], strides = [1, 1]} : vector<9x256xf32> to vector<1x256xf32>
    %12 = vector.broadcast %11 : vector<1x256xf32> to vector<8x256xf32>
    %13 = arith.mulf %10, %12 : vector<8x256xf32>
    %c15_i32 = arith.constant 15 : i32
    %14 = tpu.dynamic_rotate %4 by %c15_i32 dim 1 : vector<8x256xf32>, i32 -> vector<8x256xf32>
    %15 = vector.extract_strided_slice %5 {offsets = [2, 0], sizes = [1, 256], strides = [1, 1]} : vector<9x256xf32> to vector<1x256xf32>
    %16 = vector.broadcast %15 : vector<1x256xf32> to vector<8x256xf32>
    %17 = arith.mulf %14, %16 : vector<8x256xf32>
    %c1_i32 = arith.constant 1 : i32
    %18 = tpu.dynamic_rotate %4 by %c1_i32 dim 1 : vector<8x256xf32>, i32 -> vector<8x256xf32>
    %19 = vector.extract_strided_slice %5 {offsets = [3, 0], sizes = [1, 256], strides = [1, 1]} : vector<9x256xf32> to vector<1x256xf32>
    %20 = vector.broadcast %19 : vector<1x256xf32> to vector<8x256xf32>
    %21 = arith.mulf %18, %20 : vector<8x256xf32>
    %c255_i32 = arith.constant 255 : i32
    %22 = tpu.dynamic_rotate %4 by %c255_i32 dim 1 : vector<8x256xf32>, i32 -> vector<8x256xf32>
    %23 = vector.extract_strided_slice %5 {offsets = [5, 0], sizes = [1, 256], strides = [1, 1]} : vector<9x256xf32> to vector<1x256xf32>
    %24 = vector.broadcast %23 : vector<1x256xf32> to vector<8x256xf32>
    %25 = arith.mulf %22, %24 : vector<8x256xf32>
    %c241_i32 = arith.constant 241 : i32
    %26 = tpu.dynamic_rotate %4 by %c241_i32 dim 1 : vector<8x256xf32>, i32 -> vector<8x256xf32>
    %27 = vector.extract_strided_slice %5 {offsets = [6, 0], sizes = [1, 256], strides = [1, 1]} : vector<9x256xf32> to vector<1x256xf32>
    %28 = vector.broadcast %27 : vector<1x256xf32> to vector<8x256xf32>
    %29 = arith.mulf %26, %28 : vector<8x256xf32>
    %c240_i32 = arith.constant 240 : i32
    %30 = tpu.dynamic_rotate %4 by %c240_i32 dim 1 : vector<8x256xf32>, i32 -> vector<8x256xf32>
    %31 = vector.extract_strided_slice %5 {offsets = [7, 0], sizes = [1, 256], strides = [1, 1]} : vector<9x256xf32> to vector<1x256xf32>
    %32 = vector.broadcast %31 : vector<1x256xf32> to vector<8x256xf32>
    %33 = arith.mulf %30, %32 : vector<8x256xf32>
    %c239_i32 = arith.constant 239 : i32
    %34 = tpu.dynamic_rotate %4 by %c239_i32 dim 1 : vector<8x256xf32>, i32 -> vector<8x256xf32>
    %35 = vector.extract_strided_slice %5 {offsets = [8, 0], sizes = [1, 256], strides = [1, 1]} : vector<9x256xf32> to vector<1x256xf32>
    %36 = vector.broadcast %35 : vector<1x256xf32> to vector<8x256xf32>
    %37 = arith.mulf %34, %36 : vector<8x256xf32>
    %38 = tpu.concatenate %9, %13, %17, %21, %4, %25, %29, %33, %37 in 0 : vector<8x256xf32>, vector<8x256xf32>, vector<8x256xf32>, vector<8x256xf32>, vector<8x256xf32>, vector<8x256xf32>, vector<8x256xf32>, vector<8x256xf32>, vector<8x256xf32> -> vector<72x256xf32>
    %39 = arith.truncf %38 : vector<72x256xf32> to vector<72x256xbf16>
    %c0_7 = arith.constant 0 : index
    %c0_8 = arith.constant 0 : index
    %40 = vector.load %arg4[%c0_7, %c0_8] : memref<8x72xbf16, #tpu.memory_space<vmem>>, vector<8x72xbf16>
    %cst = arith.constant dense<0.000000e+00> : vector<8x256xf32>
    %41 = tpu.matmul %40, %39, %cst {dimension_numbers = #tpu.dot_dimension_numbers<[1], [0], [0], [1], [0, 0, 1, 1], [], []>} : vector<8x72xbf16>, vector<72x256xbf16>, vector<8x256xf32> -> vector<8x256xf32>
    %c0_9 = arith.constant 0 : index
    %c0_10 = arith.constant 0 : index
    %42 = vector.load %arg5[%c0_9, %c0_10] : memref<8x1xf32, #tpu.memory_space<vmem>>, vector<8x1xf32>
    %43 = vector.broadcast %42 : vector<8x1xf32> to vector<8x256xf32>
    %44 = arith.addf %41, %43 : vector<8x256xf32>
    %45 = vector.extract_strided_slice %44 {offsets = [0, 0], sizes = [4, 256], strides = [1, 1]} : vector<8x256xf32> to vector<4x256xf32>
    %46 = vector.extract_strided_slice %44 {offsets = [4, 0], sizes = [4, 256], strides = [1, 1]} : vector<8x256xf32> to vector<4x256xf32>
    %47 = arith.mulf %45, %46 : vector<4x256xf32>
    %cst_11 = arith.constant dense<0xFF800000> : vector<256xf32>
    %48 = vector.multi_reduction <maximumf>, %47, %cst_11 [0] : vector<4x256xf32> to vector<256xf32>
    %49 = vector.shape_cast %48 : vector<256xf32> to vector<1x256xf32>
    %50 = vector.broadcast %49 : vector<1x256xf32> to vector<4x256xf32>
    %51 = arith.subf %47, %50 : vector<4x256xf32>
    %52 = math.exp %51 : vector<4x256xf32>
    %cst_12 = arith.constant dense<0.000000e+00> : vector<256xf32>
    %53 = vector.multi_reduction <add>, %52, %cst_12 [0] : vector<4x256xf32> to vector<256xf32>
    %54 = vector.shape_cast %53 : vector<256xf32> to vector<1x256xf32>
    %55 = tpu.reciprocal %54 : vector<1x256xf32> -> vector<1x256xf32>
    %56 = vector.broadcast %55 : vector<1x256xf32> to vector<4x256xf32>
    %57 = arith.mulf %52, %56 : vector<4x256xf32>
    %c0_13 = arith.constant 0 : index
    %c0_14 = arith.constant 0 : index
    %58 = vector.load %arg6[%c0_13, %c0_14] : memref<256x1xf32, #tpu.memory_space<vmem>>, vector<256x1xf32>
    %cst_15 = arith.constant dense<0.000000e+00> : vector<4x1xf32>
    %59 = tpu.matmul %57, %58, %cst_15 {dimension_numbers = #tpu.dot_dimension_numbers<[1], [0], [0], [1], [0, 0, 1, 1], [], []>} : vector<4x256xf32>, vector<256x1xf32>, vector<4x1xf32> -> vector<4x1xf32>
    %c0_16 = arith.constant 0 : index
    %c0_17 = arith.constant 0 : index
    %60 = vector.load %arg7[%c0_16, %c0_17] : memref<2x4xf32, #tpu.memory_space<vmem>>, vector<2x4xf32>
    %cst_18 = arith.constant dense<0.000000e+00> : vector<2x1xf32>
    %61 = tpu.matmul %60, %59, %cst_18 {dimension_numbers = #tpu.dot_dimension_numbers<[1], [0], [0], [1], [0, 0, 1, 1], [], []>} : vector<2x4xf32>, vector<4x1xf32>, vector<2x1xf32> -> vector<2x1xf32>
    %c0_19 = arith.constant 0 : index
    %c0_20 = arith.constant 0 : index
    %62 = vector.load %arg8[%c0_19, %c0_20] : memref<2x1xf32, #tpu.memory_space<vmem>>, vector<2x1xf32>
    %63 = arith.addf %61, %62 : vector<2x1xf32>
    %cst_21 = arith.constant 0.000000e+00 : f32
    %64 = vector.broadcast %cst_21 : f32 to vector<2x1xf32>
    %65 = arith.maximumf %63, %64 : vector<2x1xf32>
    %c0_22 = arith.constant 0 : index
    %c0_23 = arith.constant 0 : index
    %66 = vector.load %arg9[%c0_22, %c0_23] : memref<1x2xf32, #tpu.memory_space<vmem>>, vector<1x2xf32>
    %cst_24 = arith.constant dense<0.000000e+00> : vector<1x1xf32>
    %67 = tpu.matmul %66, %65, %cst_24 {dimension_numbers = #tpu.dot_dimension_numbers<[1], [0], [0], [1], [0, 0, 1, 1], [], []>} : vector<1x2xf32>, vector<2x1xf32>, vector<1x1xf32> -> vector<1x1xf32>
    %c0_25 = arith.constant 0 : index
    %c0_26 = arith.constant 0 : index
    %68 = vector.load %arg10[%c0_25, %c0_26] : memref<1x1xf32, #tpu.memory_space<vmem>>, vector<1x1xf32>
    %69 = arith.addf %67, %68 : vector<1x1xf32>
    %c0_27 = arith.constant 0 : index
    %c0_28 = arith.constant 0 : index
    %c0_29 = arith.constant 0 : index
    %70 = vector.load %arg11[%c0_27, %c0_28, %c0_29] : memref<1x1x1xf32, #tpu.memory_space<vmem>>, vector<1x1x1xf32>
    %71 = vector.shape_cast %70 : vector<1x1x1xf32> to vector<1x1xf32>
    %72 = vector.shape_cast %69 : vector<1x1xf32> to vector<1x1x1xf32>
    tpu.vector_store %arg11[%c0_27, %c0_28, %c0_29], %72 {strides = array<i32>} : memref<1x1x1xf32, #tpu.memory_space<vmem>>, vector<1x1x1xf32>,
    return
  }
  func.func @transform_0(%arg0: i32) -> (i32, i32, i32) {
    %c0_i32 = arith.constant 0 : i32
    %c0_i32_0 = arith.constant 0 : i32
    %c0_i32_1 = arith.constant 0 : i32
    return %arg0, %c0_i32, %c0_i32_0 : i32, i32, i32
  }
  func.func @transform_1(%arg0: i32) -> (i32, i32, i32) {
    %c0_i32 = arith.constant 0 : i32
    %c0_i32_0 = arith.constant 0 : i32
    %c0_i32_1 = arith.constant 0 : i32
    return %arg0, %c0_i32, %c0_i32_0 : i32, i32, i32
  }
  func.func @transform_2(%arg0: i32) -> (i32, i32) {
    %c0_i32 = arith.constant 0 : i32
    %c0_i32_0 = arith.constant 0 : i32
    %c0_i32_1 = arith.constant 0 : i32
    return %c0_i32, %c0_i32_0 : i32, i32
  }
  func.func @transform_3(%arg0: i32) -> (i32, i32) {
    %c0_i32 = arith.constant 0 : i32
    %c0_i32_0 = arith.constant 0 : i32
    %c0_i32_1 = arith.constant 0 : i32
    return %c0_i32, %c0_i32_0 : i32, i32
  }
  func.func @transform_4(%arg0: i32) -> (i32, i32) {
    %c0_i32 = arith.constant 0 : i32
    %c0_i32_0 = arith.constant 0 : i32
    %c0_i32_1 = arith.constant 0 : i32
    return %c0_i32, %c0_i32_0 : i32, i32
  }
  func.func @transform_5(%arg0: i32) -> (i32, i32) {
    %c0_i32 = arith.constant 0 : i32
    %c0_i32_0 = arith.constant 0 : i32
    %c0_i32_1 = arith.constant 0 : i32
    return %c0_i32, %c0_i32_0 : i32, i32
  }
  func.func @transform_6(%arg0: i32) -> (i32, i32) {
    %c0_i32 = arith.constant 0 : i32
    %c0_i32_0 = arith.constant 0 : i32
    %c0_i32_1 = arith.constant 0 : i32
    return %c0_i32, %c0_i32_0 : i32, i32
  }
  func.func @transform_7(%arg0: i32) -> (i32, i32) {
    %c0_i32 = arith.constant 0 : i32
    %c0_i32_0 = arith.constant 0 : i32
    %c0_i32_1 = arith.constant 0 : i32
    return %c0_i32, %c0_i32_0 : i32, i32
  }
  func.func @transform_8(%arg0: i32) -> (i32, i32) {
    %c0_i32 = arith.constant 0 : i32
    %c0_i32_0 = arith.constant 0 : i32
    %c0_i32_1 = arith.constant 0 : i32
    return %c0_i32, %c0_i32_0 : i32, i32
  }
  func.func @transform_9(%arg0: i32) -> (i32, i32) {
    %c0_i32 = arith.constant 0 : i32
    %c0_i32_0 = arith.constant 0 : i32
    %c0_i32_1 = arith.constant 0 : i32
    return %c0_i32, %c0_i32_0 : i32, i32
  }
  func.func @transform_10(%arg0: i32) -> (i32, i32, i32) {
    %c0_i32 = arith.constant 0 : i32
    %c0_i32_0 = arith.constant 0 : i32
    %c0_i32_1 = arith.constant 0 : i32
    return %arg0, %c0_i32, %c0_i32_0 : i32, i32, i32
  }
}

</mosaic_0001>

<bundles_post_ra>
// kernel: quality_t_forward.1
= control target key start
LH: loop header
LB: loop body
LE: loop exit
PB: predicated region body
PF: predicated region fallthrough
CT: control target
= control target key end

     0   :  { %s1178_s15 = smov 0   ;;  %s1393_s0 = inlined_call_operand.vmem [shape: f32[2,4,256], index: 0, kind: input, shape index: {}]   ;;  %s1394_s1 = inlined_call_operand.vmem [shape: f32[2,4,256], index: 1, kind: input, shape index: {}]   ;;  %s1395_s2 = inlined_call_operand.vmem [shape: f32[9,256], index: 2, kind: input, shape index: {}]   ;;  %s1396_s3 = inlined_call_operand.vmem [shape: bf16[8,72], index: 3, kind: input, shape index: {}]   ;;  %s1397_s4 = inlined_call_operand.vmem [shape: f32[8,1], index: 4, kind: input, shape index: {}]   ;;  %s1398_s5 = inlined_call_operand.vmem [shape: f32[256,1], index: 5, kind: input, shape index: {}]   ;;  %s1399_s6 = inlined_call_operand.vmem [shape: f32[2,4], index: 6, kind: input, shape index: {}]   ;;  %s1400_s7 = inlined_call_operand.vmem [shape: f32[2,1], index: 7, kind: input, shape index: {}]   ;;  %s1401_s8 = inlined_call_operand.vmem [shape: f32[1,2], index: 8, kind: input, shape index: {}]   ;;  %s1402_s9 = inlined_call_operand.<no memory space> [shape: f32[1,1], index: 9, kind: input, shape index: {}]   ;;  %s1403_s10 = inlined_call_operand.vmem [shape: f32[2,1,1], index: 10, kind: output, shape index: {}]  }
   0x1   :  { %v15_v0 = vstv %s1402_s9 }
   0x2   :  { %16 = vst [vmem:[#allocation2] sm:$0x1] %v15_v0 }
   0x3 LB: > { %s969_s16 = sadd.s32 4294967295, %s1107_s15   ;;  %p973_p0 = scmp.ge.s32.totalorder %s1107_s15, 1  ;;  %s1107_s15 = sphi %s1178_s15, %s22_s15  }
   0x4   : > { %p324_p1 = scmp.lt.s32.totalorder %s1107_s15, 3 }
   0x6   : > { %p325_p2 = pnand %p973_p0, %p324_p1 }
   0x7   : > { %p365_p3 = scmp.lt.s32.totalorder (!%p325_p2), %s969_s16, 1  ;;  %vm387_vm0 = vcmask (!%p325_p2), 1043456   ;;  %s1109_s23 = smov (!%p325_p2), 16   ;;  %v1115_v7 = vmov (!%p325_p2), 0   ;;  %v543_v8 = vld [vmem:[%s1397_s4] sm:$0xff] (!%p325_p2)  ;;  %v398_v9 = vlaneseq (!%p325_p2)  ;;  %v1234_v15 = vld [vmem:[%s1395_s2 + $0x8] sm:$0xff] (!%p325_p2) }
   0x8   : > { %328 = sbr.rel (%p325_p2) target bundleno = 1097 (0x449), region = 60  ;;  %s1110_s24 = smov (!%p325_p2), 17   ;;  %591 = vmatprep.mubr.bf16.mxu0 (!%p325_p2), %v1115_v7  ;;  %1090 = vset.pattern.permute.xlu0 (!%p325_p2), %v1115_v7  ;;  %v1229_v14 = vld [vmem:[%s1395_s2] sm:$0xff] (!%p325_p2)  ;;  %vm549_vm9 = vcmask (!%p325_p2), 588800   ;;  %vm1119_vm10 = vmmov (!%p325_p2), 0   ;;  %vm750_vm11 = vcmask (!%p325_p2), 31744  }
   0x9   : > { %s1111_s25 = smov (!%p325_p2), 15   ;;  %s1112_s26 = smov (!%p325_p2), 1   ;;  %v1220_v10 = vshrl.u32 (!%p325_p2), %v398_v9, 7  ;;  %v1222_v11 = vand.u32 (!%p325_p2), 127, %v398_v9  ;;  %vm834_vm12 = vcmask (!%p325_p2), 1041408   ;;  %vm830_vm13 = vcmask (!%p325_p2), 15360  }
   0xa   : > { %s1113_s27 = smov (!%p325_p2), 127   ;;  %s1114_s28 = smov (!%p325_p2), 113   ;;  %vm908_vm14 = vcmask (!%p325_p2), 0  }
   0xb   : > { %s1116_s29 = smov (!%p325_p2), 112   ;;  %s1117_s30 = smov (!%p325_p2), 111   ;;  %v422_v12 = vsub.s32 (!%p325_p2), 1, %v1220_v10  ;;  %v405_v13 = vsub.s32 (!%p325_p2), 0, %v1220_v10  ;;  %vm417_vm1 = vcmp.lt.s32.totalorder (!%p325_p2), %v1222_v11, 16  ;;  %vm400_vm2 = vcmp.lt.s32.totalorder (!%p325_p2), %v1222_v11, 17 }
   0xc   : > { %v439_v24 = vsub.s32 (!%p325_p2), 2, %v1220_v10  ;;  %v456_v25 = vsub.s32 (!%p325_p2), 3, %v1220_v10  ;;  %vm434_vm3 = vcmp.lt.s32.totalorder (!%p325_p2), %v1222_v11, 15  ;;  %v473_v39 = vsub.s32 (!%p325_p2), 5, %v1220_v10 }
   0xd   : > { %v423_v18 = vrot.slane (!%p325_p2), %v1229_v14, %v422_v12  ;;  %v406_v19 = vrot.slane (!%p325_p2), %v1229_v14, %v405_v13  ;;  %v410_v20 = vrot.slane (!%p325_p2), %v1234_v15, %v405_v13  ;;  %v427_v21 = vrot.slane (!%p325_p2), %v1234_v15, %v422_v12 }
   0xe   : > { %v440_v38 = vrot.slane (!%p325_p2), %v1229_v14, %v439_v24  ;;  %v444_v40 = vrot.slane (!%p325_p2), %v1234_v15, %v439_v24  ;;  %vm451_vm4 = vcmp.lt.s32.totalorder (!%p325_p2), %v1222_v11, 1  ;;  %v457_v41 = vrot.slane (!%p325_p2), %v1229_v14, %v456_v25 }
   0xf   : > { %s1405_s16 = smov (!%p365_p3, %s969_s16), 1  ;;  %v461_v42 = vrot.slane %v1234_v15, %v456_v25  ;;  %vm468_vm5 = vcmp.lt.s32.totalorder %v1222_v11, 127  ;;  %v474_v49 = vrot.slane %v1229_v14, %v473_v39  ;;  %v478_v50 = vrot.slane %v1234_v15, %v473_v39  ;;  %v664_v39 = vld [vmem:[%s1398_s5 + $0x90] sm:$0xff] }
  0x10   : > { %s988_s9 = sshll.u32 %s1405_s16, 3  ;;  %v490_v61 = vsub.s32 6, %v1220_v10  ;;  %v507_v0 = vsub.s32 7, %v1220_v10  ;;  %vm485_vm6 = vcmp.lt.s32.totalorder %v1222_v11, 113  ;;  %vm502_vm7 = vcmp.lt.s32.totalorder %v1222_v11, 112  ;;  %s377_s20 = scalar_lea.vmem %s1403_s10, %s1405_s16 }
  0x11   : > { %s369_s19 = scalar_lea.vmem %s1393_s0, %s988_s9  ;;  %s374_s22 = scalar_lea.vmem %s1394_s1, %s988_s9  ;;  %vm519_vm8 = vcmp.lt.s32.totalorder %v1222_v11, 111 }
  0x12   : > { %v379_v1 = vld [vmem:[%s369_s19] sm:$0xff]  ;;  %v491_v7 = vrot.slane %v1229_v14, %v490_v61  ;;  %v508_v9 = vrot.slane %v1229_v14, %v507_v0  ;;  %v512_v10 = vrot.slane %v1234_v15, %v507_v0  ;;  %v979_v14 = vld [vmem:[%s1395_s2 + $0x18] ss:$0 sm:$0xff] }
  0x13   : > { %v380_v2 = vld [vmem:[%s374_s22] sm:$0xff]  ;;  %v382_v4 = vcombine.high %v379_v1, %v379_v1 }
  0x14   : > { %v385_v3 = vcombine.low %v380_v2, %v380_v2 }
  0x15   : > { %v1201_v6 = vsel %vm387_vm0, %v382_v4, %v380_v2 }
  0x16   : > { %v1196_v5 = vsel %vm387_vm0, %v379_v1, %v385_v3 }
  0x17   : > { %413 = vrot.lane.b32.xlu1 %v1196_v5, %s1109_s23  ;;  %394 = vrot.lane.b32.xlu0 %v1196_v5, %s1110_s24 }
  0x1b   : > { %415 = vrot.lane.b32.xlu1 %v1201_v6, %s1109_s23  ;;  %396 = vrot.lane.b32.xlu0 %v1201_v6, %s1110_s24 }
  0x1f   : > { %432 = vrot.lane.b32.xlu1 %v1201_v6, %s1111_s25  ;;  %430 = vrot.lane.b32.xlu0 %v1196_v5, %s1111_s25 }
  0x23   : > { %449 = vrot.lane.b32.xlu1 %v1201_v6, %s1112_s26  ;;  %447 = vrot.lane.b32.xlu0 %v1196_v5, %s1112_s26 }
  0x27   : > { %466 = vrot.lane.b32.xlu1 %v1201_v6, %s1113_s27  ;;  %464 = vrot.lane.b32.xlu0 %v1196_v5, %s1113_s27 }
  0x2b   : > { %483 = vrot.lane.b32.xlu1 %v1201_v6, %s1114_s28  ;;  %481 = vrot.lane.b32.xlu0 %v1196_v5, %s1114_s28 }
  0x2f   : > { %500 = vrot.lane.b32.xlu1 %v1201_v6, %s1116_s29  ;;  %498 = vrot.lane.b32.xlu0 %v1196_v5, %s1116_s29 }
  0x33   : > { %517 = vrot.lane.b32.xlu1 %v1201_v6, %s1117_s30  ;;  %515 = vrot.lane.b32.xlu0 %v1196_v5, %s1117_s30 }
  0x37   : > { %546 = vperm.xlu0 %1090, %v543_v8   ;;  %v495_v8 = vrot.slane %v1234_v15, %v490_v61  ;;  %v655_v61 = vld [vmem:[%s1398_s5 + $0x48] sm:$0xff] }
  0x89   : > { %v414_v16 = vpop.permute.xlu1 %413  ;;  %v395_v17 = vpop.permute.xlu0 %394 }
  0x8d   : > { %v416_v22 = vpop.permute.xlu1 %415  ;;  %v397_v23 = vpop.permute.xlu0 %396 }
  0x8e   : > { %v418_v26 = vsel %vm417_vm1, %v414_v16, %v416_v22  ;;  %v419_v27 = vsel %vm417_vm1, %v416_v22, %v414_v16  ;;  %v401_v28 = vsel %vm400_vm2, %v395_v17, %v397_v23  ;;  %v402_v29 = vsel %vm400_vm2, %v397_v23, %v395_v17  ;;  %v978_v22 = vld [vmem:[%s1395_s2 + $0x10] ss:$0 sm:$0xff] }
  0x8f   : > { %v428_v30 = vmul.f32 %v423_v18, %v419_v27  ;;  %v411_v31 = vmul.f32 %v406_v19, %v402_v29  ;;  %v412_v32 = vmul.f32 %v410_v20, %v401_v28  ;;  %v429_v33 = vmul.f32 %v427_v21, %v418_v26 }
  0x91   : > { %v433_v34 = vpop.permute.xlu1 %432  ;;  %v431_v35 = vpop.permute.xlu0 %430  ;;  %v533_v36 = vpack.c.bf16 %v429_v33, %v412_v32  ;;  %v532_v37 = vpack.c.bf16 %v428_v30, %v411_v31  ;;  %v542_v32 = vld [vmem:[%s1396_s3] sm:$0xf] }
  0x92   : > { %v435_v43 = vsel %vm434_vm3, %v431_v35, %v433_v34  ;;  %v436_v44 = vsel %vm434_vm3, %v433_v34, %v431_v35  ;;  %v662_v33 = vld [vmem:[%s1398_s5 + $0x80] sm:$0xff]  ;;  %v663_v34 = vld [vmem:[%s1398_s5 + $0x88] sm:$0xff] }
  0x93   : > { %559 = vmatprep.subr.bf16.mxu0 %v533_v36  ;;  %v445_v51 = vmul.f32 %v440_v38, %v436_v44  ;;  %v446_v52 = vmul.f32 %v444_v40, %v435_v43  ;;  %v1039_v35 = vpack.c.bf16 %v663_v34, %v662_v33  ;;  %v646_v36 = vld [vmem:[%s1398_s5] sm:$0xff]  ;;  %v665_v40 = vld [vmem:[%s1398_s5 + $0x98] sm:$0xff] }
  0x94   : > { %560 = vmatpush1.bf16.msra.mxu0 %v532_v37  ;;  %v647_v37 = vld [vmem:[%s1398_s5 + $0x8] sm:$0xff]  ;;  %v649_v43 = vld [vmem:[%s1398_s5 + $0x18] sm:$0xff] }
  0x95   : > { %v450_v45 = vpop.permute.xlu1 %449  ;;  %v448_v46 = vpop.permute.xlu0 %447  ;;  %v1041_v38 = vpack.c.bf16 %v647_v37, %v646_v36  ;;  %1040 = vmatprep.subr.bf16.mxu1 %v1039_v35 }
  0x96   : > { %v452_v47 = vsel %vm451_vm4, %v448_v46, %v450_v45  ;;  %v453_v48 = vsel %vm451_vm4, %v450_v45, %v448_v46  ;;  %v666_v45 = vld [vmem:[%s1398_s5 + $0xa0] sm:$0xff]  ;;  %v667_v46 = vld [vmem:[%s1398_s5 + $0xa8] sm:$0xff] }
  0x97   : > { %v462_v53 = vmul.f32 %v457_v41, %v453_v48  ;;  %v463_v54 = vmul.f32 %v461_v42, %v452_v47  ;;  %1042 = vmatpush3.bf16.msra.mxu1 %v1041_v38  ;;  %v1043_v41 = vpack.c.bf16 %v665_v40, %v664_v39  ;;  %v648_v42 = vld [vmem:[%s1398_s5 + $0x10] sm:$0xff]  ;;  %v1047_v47 = vpack.c.bf16 %v667_v46, %v666_v45  ;;  %v650_v48 = vld [vmem:[%s1398_s5 + $0x20] sm:$0xff] }
  0x98   : > { %v1045_v44 = vpack.c.bf16 %v649_v43, %v648_v42 }
  0x99   : > { %v467_v55 = vpop.permute.xlu1 %466  ;;  %v465_v56 = vpop.permute.xlu0 %464  ;;  %v535_v57 = vpack.c.bf16 %v463_v54, %v446_v52  ;;  %v534_v58 = vpack.c.bf16 %v462_v53, %v445_v51  ;;  %1044 = vmatprep.subr.bf16.mxu1 %v1043_v41  ;;  %v668_v51 = vld [vmem:[%s1398_s5 + $0xb0] sm:$0xff]  ;;  %v669_v52 = vld [vmem:[%s1398_s5 + $0xb8] sm:$0xff] }
  0x9a   : > { %v469_v59 = vsel %vm468_vm5, %v465_v56, %v467_v55  ;;  %v470_v60 = vsel %vm468_vm5, %v467_v55, %v465_v56  ;;  %v652_v53 = vld [vmem:[%s1398_s5 + $0x30] sm:$0xff]  ;;  %v1051_v54 = vpack.c.bf16 %v669_v52, %v668_v51  ;;  %v653_v55 = vld [vmem:[%s1398_s5 + $0x38] sm:$0xff]  ;;  %v670_v56 = vld [vmem:[%s1398_s5 + $0xc0] sm:$0xff] }
  0x9b   : > { %v479_v62 = vmul.f32 %v474_v49, %v469_v59  ;;  %v480_v63 = vmul.f32 %v478_v50, %v470_v60  ;;  %561 = vmatprep.subr.bf16.mxu0 %v535_v57  ;;  %1046 = vmatpush3.bf16.msra.mxu1 %v1045_v44  ;;  %v651_v49 = vld [vmem:[%s1398_s5 + $0x28] sm:$0xff]  ;;  %v654_v60 = vld [vmem:[%s1398_s5 + $0x40] sm:$0xff] }
  0x9c   : > { %562 = vmatpush1.bf16.msra.mxu0 %v534_v58  ;;  %v1049_v50 = vpack.c.bf16 %v651_v49, %v650_v48  ;;  %1048 = vmatprep.subr.bf16.mxu1 %v1047_v47  ;;  %v671_v57 = vld [vmem:[%s1398_s5 + $0xc8] sm:$0xff]  ;;  %v1053_v58 = vpack.c.bf16 %v653_v55, %v652_v53  ;;  %v1057_v0 = vpack.c.bf16 %v655_v61, %v654_v60 }
  0x9d   : > { %v484_v1 = vpop.permute.xlu1 %483  ;;  %v482_v2 = vpop.permute.xlu0 %481  ;;  %v537_v3 = vpack.c.bf16 %v480_v63, %v1201_v6  ;;  %v536_v4 = vpack.c.bf16 %v479_v62, %v1196_v5  ;;  %v1055_v59 = vpack.c.bf16 %v671_v57, %v670_v56  ;;  %v672_v62 = vld [vmem:[%s1398_s5 + $0xd0] sm:$0xff]  ;;  %v673_v63 = vld [vmem:[%s1398_s5 + $0xd8] sm:$0xff] }
  0x9e   : > { %v486_v12 = vsel %vm485_vm6, %v482_v2, %v484_v1  ;;  %v487_v13 = vsel %vm485_vm6, %v484_v1, %v482_v2  ;;  %v1059_v1 = vpack.c.bf16 %v673_v63, %v672_v62  ;;  %v656_v2 = vld [vmem:[%s1398_s5 + $0x50] sm:$0xff] }
  0x9f   : > { %563 = vmatprep.subr.bf16.mxu0 %v537_v3  ;;  %v496_v5 = vmul.f32 %v491_v7, %v486_v12  ;;  %v497_v19 = vmul.f32 %v495_v8, %v487_v13  ;;  %1050 = vmatpush3.bf16.msra.mxu1 %v1049_v50  ;;  %v657_v3 = vld [vmem:[%s1398_s5 + $0x58] sm:$0xff]  ;;  %v675_v7 = vld [vmem:[%s1398_s5 + $0xe8] sm:$0xff]  ;;  %v676_v13 = vld [vmem:[%s1398_s5 + $0xf0] sm:$0xff] }
  0xa0   : > { %564 = vmatpush1.bf16.msra.mxu0 %v536_v4  ;;  %1052 = vmatprep.subr.bf16.mxu1 %v1051_v54  ;;  %v674_v4 = vld [vmem:[%s1398_s5 + $0xe0] sm:$0xff]  ;;  %v1061_v8 = vpack.c.bf16 %v657_v3, %v656_v2  ;;  %v659_v12 = vld [vmem:[%s1398_s5 + $0x68] sm:$0xff]  ;;  %v1118_v2 = vmov 0.0  }
  0xa1   : > { %v501_v16 = vpop.permute.xlu1 %500  ;;  %v499_v17 = vpop.permute.xlu0 %498 }
  0xa2   : > { %v503_v18 = vsel %vm502_vm7, %v499_v17, %v501_v16  ;;  %v504_v6 = vsel %vm502_vm7, %v501_v16, %v499_v17  ;;  %v677_v16 = vld [vmem:[%s1398_s5 + $0xf8] sm:$0xff] }
  0xa3   : > { %v513_v20 = vmul.f32 %v508_v9, %v503_v18  ;;  %v514_v21 = vmul.f32 %v512_v10, %v504_v6  ;;  %1054 = vmatpush3.bf16.msra.mxu1 %v1053_v58  ;;  %v1063_v9 = vpack.c.bf16 %v675_v7, %v674_v4  ;;  %v658_v10 = vld [vmem:[%s1398_s5 + $0x60] sm:$0xff]  ;;  %v1067_v18 = vpack.c.bf16 %v677_v16, %v676_v13  ;;  %v660_v6 = vld [vmem:[%s1398_s5 + $0x70] sm:$0xff] }
  0xa4   : > { %1056 = vmatprep.subr.bf16.mxu1 %v1055_v59  ;;  %v1065_v17 = vpack.c.bf16 %v659_v12, %v658_v10 }
  0xa5   : > { %v518_v15 = vpop.permute.xlu1 %517  ;;  %v516_v23 = vpop.permute.xlu0 %515  ;;  %v539_v24 = vpack.c.bf16 %v514_v21, %v497_v19  ;;  %v538_v25 = vpack.c.bf16 %v513_v20, %v496_v5  ;;  %v661_v5 = vld [vmem:[%s1398_s5 + $0x78] sm:$0xff] }
  0xa6   : > { %v520_v26 = vsel %vm519_vm8, %v516_v23, %v518_v15  ;;  %v521_v27 = vsel %vm519_vm8, %v518_v15, %v516_v23  ;;  %v1069_v19 = vpack.c.bf16 %v661_v5, %v660_v6 }
  0xa7   : > { %v530_v28 = vmul.f32 %v978_v22, %v520_v26  ;;  %v531_v11 = vmul.f32 %v979_v14, %v521_v27  ;;  %565 = vmatprep.subr.bf16.mxu0 %v539_v24  ;;  %1058 = vmatpush3.bf16.msra.mxu1 %v1057_v0 }
  0xa8   : > { %566 = vmatpush1.bf16.msra.mxu0 %v538_v25  ;;  %1060 = vmatprep.subr.bf16.mxu1 %v1059_v1 }
  0xa9   : > { %v540_v29 = vpack.c.bf16 %v530_v28, %v530_v28  ;;  %v541_v30 = vpack.c.bf16 %v531_v11, %v531_v11 }
  0xab   : > { %980 = vmatprep.subr.msk.bf16.mxu0 %vm387_vm0, %v541_v30  ;;  %v554_v31 = vsel %vm387_vm0, %v540_v29, 0  ;;  %1062 = vmatpush3.bf16.msra.mxu1 %v1061_v8  ;;  %v748_v8 = vld [vmem:[%s1399_s6] sm:$0x3] }
  0xac   : > { %568 = vmatpush1.bf16.msra.mxu0 %v554_v31  ;;  %1064 = vmatprep.subr.bf16.mxu1 %v1063_v9  ;;  %v749_v9 = vld [vmem:[%s1400_s7] sm:$0x3] }
  0xad   : > { %1029 = vmatprep.subr.mxu0 %v1118_v2 }
  0xaf   : > { %981 = vmatmul.mubr.msk.bf16.vlgmr.msra.gmra.mrb[0].mxu0 %vm549_vm9, %v542_v32  ;;  %1066 = vmatpush3.bf16.msra.mxu1 %v1065_v17  ;;  %v828_v17 = vld [vmem:[%s1401_s8] sm:$0x1] }
  0xb0   : > { %1068 = vmatprep.subr.bf16.mxu1 %v1067_v18  ;;  %1031 = vmatprep.mubr.msk.f32.mxu0 %vm1119_vm10, %v1118_v2  ;;  %v829_v18 = vld [vmem:[#allocation2] sm:$0x1] }
  0xb3   : > { %1070 = vmatpush3.bf16.msra.mxu1 %v1069_v19 }
  0xb6   : > { %v547_v20 = vpop.permute.xlu0 %546 }
 0x182   : > { %v593_v21 = vpop.f32.mrb[0].mxu0 }
 0x183   : > { %v594_v22 = vadd.f32 %v593_v21, %v547_v20  ;;  %v595_v14 = vpop.f32.mrb[1].mxu0 }
 0x184   : > { %v596_v15 = vadd.f32 %v595_v14, %v547_v20  ;;  %v597_v23 = vpop.f32.mrb[2].mxu0 }
 0x185   : > { %v602_v24 = vrot.slane %v594_v22, 4  ;;  %v598_v25 = vpop.f32.mrb[3].mxu0 }
 0x186   : > { %v603_v26 = vrot.slane %v596_v15, 4 }
 0x187   : > { %v606_v27 = vmul.f32 %v602_v24, %v594_v22 }
 0x188   : > { %v607_v28 = vmul.f32 %v603_v26, %v596_v15 }
 0x189   : > { %v608_v11 = vsel %vm387_vm0, %v606_v27, -inf }
 0x18a   : > { %v609_v29 = vrot.slane %v608_v11, 4  ;;  %v615_v30 = vsel %vm387_vm0, %v607_v28, -inf }
 0x18b   : > { %v616_v31 = vrot.slane %v615_v30, 4 }
 0x18c   : > { %v610_v32 = vmax.f32 %v608_v11, %v609_v29 }
 0x18d   : > { %v617_v33 = vmax.f32 %v615_v30, %v616_v31 }
 0x18e   : > { %v611_v34 = vrot.slane %v610_v32, 2 }
 0x18f   : > { %v618_v35 = vrot.slane %v617_v33, 2 }
 0x190   : > { %v612_v36 = vmax.f32 %v610_v32, %v611_v34 }
 0x191   : > { %v619_v37 = vmax.f32 %v617_v33, %v618_v35 }
 0x192   : > { %v613_v38 = vrot.slane %v612_v36, 1 }
 0x193   : > { %v620_v39 = vrot.slane %v619_v37, 1 }
 0x194   : > { %v614_v40 = vmax.f32 %v612_v36, %v613_v38 }
 0x195   : > { %v621_v41 = vmax.f32 %v619_v37, %v620_v39 }
 0x196   : > { %v622_v42 = vsub.f32 %v606_v27, %v614_v40 }
 0x197   : > { %v623_v43 = vsub.f32 %v607_v28, %v621_v41 }
 0x198   : > { %v624_v44 = vmul.f32 1.442695, %v622_v42 }
 0x199   : > { %v626_v45 = vmul.f32 1.442695, %v623_v43 }
 0x19a   : > { %1093 = vpow2.f32 %v624_v44 }
 0x19b   : > { %1095 = vpow2.f32 %v626_v45 }
 0x1a4   : > { %v1094_v46 = vpop.eup %1093 }
 0x1a5   : > { %v1096_v47 = vpop.eup %1095  ;;  %v628_v48 = vsel %vm387_vm0, %v1094_v46, 0.0 }
 0x1a6   : > { %v629_v49 = vrot.slane %v628_v48, 4  ;;  %v635_v50 = vsel %vm387_vm0, %v1096_v47, 0.0 }
 0x1a7   : > { %v636_v51 = vrot.slane %v635_v50, 4 }
 0x1a8   : > { %v630_v52 = vadd.f32 %v629_v49, %v628_v48 }
 0x1a9   : > { %v637_v53 = vadd.f32 %v636_v51, %v635_v50 }
 0x1aa   : > { %v631_v54 = vrot.slane %v630_v52, 2 }
 0x1ab   : > { %v638_v55 = vrot.slane %v637_v53, 2 }
 0x1ac   : > { %v632_v56 = vadd.f32 %v631_v54, %v630_v52 }
 0x1ad   : > { %v639_v57 = vadd.f32 %v638_v55, %v637_v53 }
 0x1ae   : > { %v633_v58 = vrot.slane %v632_v56, 1 }
 0x1af   : > { %v640_v59 = vrot.slane %v639_v57, 1 }
 0x1b0   : > { %v634_v60 = vadd.f32 %v633_v58, %v632_v56 }
 0x1b1   : > { %v641_v61 = vadd.f32 %v640_v59, %v639_v57 }
 0x1b2   : > { %1097 = vrcp.f32 %v634_v60 }
 0x1b3   : > { %1099 = vrcp.f32 %v641_v61 }
 0x1bc   : > { %v1098_v62 = vpop.eup %1097 }
 0x1bd   : > { %v1100_v63 = vpop.eup %1099  ;;  %v644_v1 = vmul.f32 %v1098_v62, %v1094_v46 }
 0x1be   : > { %v645_v0 = vmul.f32 %v1100_v63, %v1096_v47 }
 0x1c0   : > { %742 = vmatprep.mubr.f32.mxu1 %v645_v0 }
 0x1c1   : > { %743 = vmatmul.mubr.f32.vlgmr.msra.gmra.mrb[0].mxu1 %v644_v1 }
 0x294   : > { %v1022_v3 = vpop.f32.mrb[0].mxu1 }
 0x295   : > { %v1023_v4 = vpop.f32.mrb[1].mxu1 }
 0x296   : > { %v1024_v7 = vadd.f32 %v1023_v4, %v1022_v3 }
 0x298   : > { %1030 = vmatpush3.msk.msra.mxu0 %vm387_vm0, %v1024_v7 }
 0x299   : > { %1032 = vmatmul.mubr.msk.f32.vlgmr.msra.gmra.mrb[4].mxu0 %vm750_vm11, %v748_v8  ;;  %1034 = vmatprep.subr.mxu0 %v1118_v2 }
 0x29a   : > { %1036 = vmatprep.mubr.msk.f32.mxu0 %vm1119_vm10, %v1118_v2 }
 0x36c   : > { %v823_v10 = vpop.f32.mrb[4].mxu0 }
 0x36d   : > { %v824_v12 = vadd.f32 %v823_v10, %v749_v9  ;;  %v1033_v13 = vpop.f32.mrb[5].mxu0 }
 0x36f   : > { %v827_v16 = vmax.f32 %v824_v12, 0.0 }
 0x371   : > { %1035 = vmatpush3.msk.msra.mxu0 %vm834_vm12, %v827_v16 }
 0x372   : > { %1037 = vmatmul.mubr.msk.f32.vlgmr.msra.gmra.mrb[6].mxu0 %vm830_vm13, %v828_v17 }
 0x445   : > { %v904_v6 = vpop.f32.mrb[6].mxu0 }
 0x446   : > { %v905_v5 = vadd.f32 %v904_v6, %v829_v18  ;;  %v1038_v19 = vpop.f32.mrb[7].mxu0 }
 0x448   : > { %909 = vst.msk [vmem:[%s377_s20] sm:$0x1] %vm908_vm14, %v905_v5 }
 0x449 PF: > { %s22_s15 = sadd.s32 1, %s1107_s15  }
 0x44a   : > { %p19_p4 = scmp.ge.s32.totalorder %s22_s15, 4  }
 0x44c   :  { %21 = sbr.rel (!%p19_p4) target bundleno = 3 (0x3), region = 93 }

</bundles_post_ra>
